<compile_context>
chip_gen: v7x
topology: tpu7x:2x2x1
jax: 0.10.0
libtpu: 0.0.40
codegen_flags: <defaults>
</compile_context>

<pallas_src>
import functools

import jax
import jax.numpy as jnp
import numpy as np
from jax.experimental import pallas as pl
from jax.experimental.pallas import tpu as pltpu


def _ceil_pool_out(size, k=3, s=2):
    # PyTorch MaxPool2d, padding=0, ceil_mode=True
    out = -(-(size - k) // s) + 1
    if (out - 1) * s >= size:          # last window must start inside input
        out -= 1
    return out


def _fused_kernel(patch_ref, w_ref, bias_ref, mask_ref, sel_ref, o_ref, y_scr,
                  *, wpc, lsel):
    """Fused conv3x3(s2)+BN+ReLU+maxpool3x3(s2,ceil) for the whole batch.

    patch_ref: (MP, 9*Cin)   im2col patches over the padded conv-output grid
    w_ref    : (9*Cin, Cout) conv weights with BN scale folded in
    bias_ref : (1, Cout)     folded BN bias (beta - mean*scale)
    mask_ref : (MP, 1)       1.0 for real conv outputs, 0.0 for grid padding
    sel_ref  : (NPOOL, LSEL) one-hot pool-window selection matrix
    o_ref    : (NPOOL, Cout) pooled output (flat (n, i, j) rows)
    y_scr    : (MP, Cout)    VMEM scratch holding the padded conv grid
    """
    # Conv (stride-2 3x3) + BN scale: ONE MXU matmul for the whole batch.
    acc = jnp.dot(patch_ref[...], w_ref[...],
                  preferred_element_type=jnp.float32)
    # BN bias + ReLU on the VPU; multiplicative mask zeroes padded-grid rows
    # (safe for the max-pool because ReLU output is >= 0).
    y = jnp.maximum(acc + bias_ref[...], 0.0) * mask_ref[...]
    # Single bulk store of the flat padded conv-output grid.
    y_scr[...] = y
    # MaxPool2d(k=3, s=2, pad=0, ceil_mode=True): elementwise max of the 9
    # flat-shifted views of the padded grid -- static pl.ds row selects only.
    m = y_scr[pl.ds(0, lsel), :]
    for dh in range(3):
        for dw in range(3):
            if dh == 0 and dw == 0:
                continue
            m = jnp.maximum(m, y_scr[pl.ds(dh * wpc + dw, lsel), :])
    # Stride-2 window selection as an exact one-hot matmul (static gather on
    # the MXU); one bulk store of the pooled result.
    o_ref[...] = jnp.dot(sel_ref[...], m,
                         preferred_element_type=jnp.float32).astype(o_ref.dtype)


def shuffle_init_block(x_nchw, w_hwio, gamma, beta, run_mean, run_var, eps=1e-5):
    """Forward pass of ShuffleInitBlock.  x_nchw: (N, Cin, H, W) float32."""
    n, cin, h, w = x_nchw.shape
    cout = w_hwio.shape[-1]

    # conv output dims (k=3, stride=2, pad=1)
    ho = (h + 2 - 3) // 2 + 1
    wo = (w + 2 - 3) // 2 + 1
    # pool output dims (k=3, stride=2, pad=0, ceil_mode=True)
    po_h = _ceil_pool_out(ho)
    po_w = _ceil_pool_out(wo)
    # padded conv-output grid: pooling becomes 9 flat row shifts + subsample
    hpc = 2 * po_h + 1
    wpc = 2 * po_w + 1
    mp = n * hpc * wpc                  # matmul M dimension (batch folded in)
    lsel = mp - (2 * wpc + 2)           # length of each shifted view
    npool = n * po_h * po_w

    # ---------------- XLA-side layout glue --------------------------------
    # NCHW -> NHWC (channels on the TPU lane dim).
    x = jnp.transpose(x_nchw, (0, 2, 3, 1)).astype(jnp.float32)
    # conv padding (1 px) + extra bottom/right zeros covering the padded grid.
    ph_extra = max(0, (2 * hpc + 1) - (h + 2))
    pw_extra = max(0, (2 * wpc + 1) - (w + 2))
    xp = jnp.pad(x, ((0, 0), (1, 1 + ph_extra), (1, 1 + pw_extra), (0, 0)))

    # im2col of the stride-2 3x3 conv over the padded output grid.
    cols = []
    for kh in range(3):
        for kw in range(3):
            cols.append(xp[:, kh:kh + 2 * hpc:2, kw:kw + 2 * wpc:2, :])
    patch = jnp.concatenate(cols, axis=-1).reshape(mp, 9 * cin)

    # fold BatchNorm (eval mode): scale into the weights, bias kept separate.
    scale = (gamma / jnp.sqrt(run_var + eps)).astype(jnp.float32)
    wmat = (w_hwio.reshape(9 * cin, cout) * scale[None, :]).astype(jnp.float32)
    bias = (beta - run_mean * scale).reshape(1, cout).astype(jnp.float32)

    # validity mask over the padded conv grid (1 = real output, 0 = padding).
    valid = (np.arange(hpc)[:, None] < ho) & (np.arange(wpc)[None, :] < wo)
    mask = np.broadcast_to(valid[None], (n, hpc, wpc)).reshape(mp, 1)
    mask = jnp.asarray(mask, jnp.float32)

    # one-hot pool-window selection (row r -> flat index of window top-left).
    sel = np.zeros((npool, lsel), np.float32)
    for nn in range(n):
        for i in range(po_h):
            for j in range(po_w):
                r = (nn * po_h + i) * po_w + j
                sel[r, nn * hpc * wpc + 2 * i * wpc + 2 * j] = 1.0
    sel = jnp.asarray(sel)

    # ---------------- single fused Pallas invocation ----------------------
    kernel = functools.partial(_fused_kernel, wpc=wpc, lsel=lsel)
    vmem_spec = pl.BlockSpec(memory_space=pltpu.MemorySpace.VMEM)
    out_flat = pl.pallas_call(
        kernel,
        out_shape=jax.ShapeDtypeStruct((npool, cout), jnp.float32),
        in_specs=[vmem_spec, vmem_spec, vmem_spec, vmem_spec, vmem_spec],
        out_specs=vmem_spec,
        scratch_shapes=[pltpu.VMEM((mp, cout), jnp.float32)],
    )(patch, wmat, bias, mask, sel)

    # flat (n, i, j, c) rows -> NCHW to match the PyTorch output convention.
    out = out_flat.reshape(n, po_h, po_w, cout)
    return jnp.transpose(out, (0, 3, 1, 2))


def _reference(x_nchw, w_hwio, gamma, beta, run_mean, run_var, eps=1e-5):
    """Pure-JAX reference (XLA conv + reduce_window) for correctness checking."""
    x = jnp.transpose(x_nchw, (0, 2, 3, 1))
    y = jax.lax.conv_general_dilated(
        x, w_hwio, window_strides=(2, 2), padding=((1, 1), (1, 1)),
        dimension_numbers=('NHWC', 'HWIO', 'NHWC'))
    scale = gamma / jnp.sqrt(run_var + eps)
    y = jnp.maximum(y * scale + (beta - run_mean * scale), 0.0)
    ho, wo = y.shape[1], y.shape[2]
    po_h, po_w = _ceil_pool_out(ho), _ceil_pool_out(wo)
    pad_h = 2 * (po_h - 1) + 3 - ho
    pad_w = 2 * (po_w - 1) + 3 - wo
    pooled = jax.lax.reduce_window(
        y, -jnp.inf, jax.lax.max,
        window_dimensions=(1, 3, 3, 1), window_strides=(1, 2, 2, 1),
        padding=((0, 0), (0, pad_h), (0, pad_w), (0, 0)))
    return jnp.transpose(pooled, (0, 3, 1, 2))


if __name__ == "__main__":
    # Small deterministic configuration consistent with the module:
    # in_channels=4, out_channels=24, input NCHW (2, 4, 16, 16).
    key = jax.random.PRNGKey(0)
    kx, kw, kg, kb, km, kv = jax.random.split(key, 6)

    N, Cin, H, W = 2, 4, 16, 16
    Cout = 24

    x = jax.random.normal(kx, (N, Cin, H, W), jnp.float32)
    w = jax.random.normal(kw, (3, 3, Cin, Cout), jnp.float32) * 0.1  # HWIO
    gamma = jax.random.uniform(kg, (Cout,), minval=0.5, maxval=1.5)
    beta = jax.random.normal(kb, (Cout,)) * 0.1
    run_mean = jax.random.normal(km, (Cout,)) * 0.1
    run_var = jax.random.uniform(kv, (Cout,), minval=0.5, maxval=1.5)

    out = shuffle_init_block(x, w, gamma, beta, run_mean, run_var)
    out = jax.block_until_ready(out)

    ref = jax.block_until_ready(_reference(x, w, gamma, beta, run_mean, run_var))

    assert out.shape == (N, Cout, 4, 4), out.shape
    np.testing.assert_allclose(np.asarray(out), np.asarray(ref),
                               atol=2e-4, rtol=2e-4)
    print("KERNEL_OK")
</pallas_src>

<mosaic_0001>
module attributes {stable_mosaic.version = 11 : i64} {
  func.func @_fused_kernel(%arg0: memref<162x36xf32, #tpu.memory_space<vmem>>, %arg1: memref<36x24xf32, #tpu.memory_space<vmem>>, %arg2: memref<1x24xf32, #tpu.memory_space<vmem>>, %arg3: memref<162x1xf32, #tpu.memory_space<vmem>>, %arg4: memref<32x142xf32, #tpu.memory_space<vmem>>, %arg5: memref<32x24xf32, #tpu.memory_space<vmem>>, %arg6: memref<162x24xf32, #tpu.memory_space<vmem>>) attributes {dimension_semantics = [], scalar_prefetch = 0 : i64, scratch_operands = 1 : i64, tpu.core_type = #tpu.core_type<tc>} {
    %c0 = arith.constant 0 : index
    %c0_0 = arith.constant 0 : index
    %0 = vector.load %arg0[%c0, %c0_0] : memref<162x36xf32, #tpu.memory_space<vmem>>, vector<162x36xf32>
    %c0_1 = arith.constant 0 : index
    %c0_2 = arith.constant 0 : index
    %1 = vector.load %arg1[%c0_1, %c0_2] : memref<36x24xf32, #tpu.memory_space<vmem>>, vector<36x24xf32>
    %cst = arith.constant dense<0.000000e+00> : vector<162x24xf32>
    %2 = tpu.matmul %0, %1, %cst {dimension_numbers = #tpu.dot_dimension_numbers<[1], [0], [0], [1], [0, 0, 1, 1], [], []>} : vector<162x36xf32>, vector<36x24xf32>, vector<162x24xf32> -> vector<162x24xf32>
    %c0_3 = arith.constant 0 : index
    %c0_4 = arith.constant 0 : index
    %3 = vector.load %arg2[%c0_3, %c0_4] : memref<1x24xf32, #tpu.memory_space<vmem>>, vector<1x24xf32>
    %4 = vector.broadcast %3 : vector<1x24xf32> to vector<162x24xf32>
    %5 = arith.addf %2, %4 : vector<162x24xf32>
    %cst_5 = arith.constant 0.000000e+00 : f32
    %6 = vector.broadcast %cst_5 : f32 to vector<162x24xf32>
    %7 = arith.maximumf %5, %6 : vector<162x24xf32>
    %c0_6 = arith.constant 0 : index
    %c0_7 = arith.constant 0 : index
    %8 = vector.load %arg3[%c0_6, %c0_7] : memref<162x1xf32, #tpu.memory_space<vmem>>, vector<162x1xf32>
    %9 = vector.broadcast %8 : vector<162x1xf32> to vector<162x24xf32>
    %10 = arith.mulf %7, %9 : vector<162x24xf32>
    %c0_8 = arith.constant 0 : index
    %c0_9 = arith.constant 0 : index
    %11 = vector.load %arg6[%c0_8, %c0_9] : memref<162x24xf32, #tpu.memory_space<vmem>>, vector<162x24xf32>
    tpu.vector_store %arg6[%c0_8, %c0_9], %10 {strides = array<i32>} : memref<162x24xf32, #tpu.memory_space<vmem>>, vector<162x24xf32>,
    %c0_10 = arith.constant 0 : index
    %c0_11 = arith.constant 0 : index
    %12 = vector.load %arg6[%c0_10, %c0_11] : memref<162x24xf32, #tpu.memory_space<vmem>>, vector<142x24xf32>
    %c1 = arith.constant 1 : index
    %c0_12 = arith.constant 0 : index
    %13 = vector.load %arg6[%c1, %c0_12] : memref<162x24xf32, #tpu.memory_space<vmem>>, vector<142x24xf32>
    %14 = arith.maximumf %12, %13 : vector<142x24xf32>
    %c2 = arith.constant 2 : index
    %c0_13 = arith.constant 0 : index
    %15 = vector.load %arg6[%c2, %c0_13] : memref<162x24xf32, #tpu.memory_space<vmem>>, vector<142x24xf32>
    %16 = arith.maximumf %14, %15 : vector<142x24xf32>
    %c9 = arith.constant 9 : index
    %c0_14 = arith.constant 0 : index
    %17 = vector.load %arg6[%c9, %c0_14] : memref<162x24xf32, #tpu.memory_space<vmem>>, vector<142x24xf32>
    %18 = arith.maximumf %16, %17 : vector<142x24xf32>
    %c10 = arith.constant 10 : index
    %c0_15 = arith.constant 0 : index
    %19 = vector.load %arg6[%c10, %c0_15] : memref<162x24xf32, #tpu.memory_space<vmem>>, vector<142x24xf32>
    %20 = arith.maximumf %18, %19 : vector<142x24xf32>
    %c11 = arith.constant 11 : index
    %c0_16 = arith.constant 0 : index
    %21 = vector.load %arg6[%c11, %c0_16] : memref<162x24xf32, #tpu.memory_space<vmem>>, vector<142x24xf32>
    %22 = arith.maximumf %20, %21 : vector<142x24xf32>
    %c18 = arith.constant 18 : index
    %c0_17 = arith.constant 0 : index
    %23 = vector.load %arg6[%c18, %c0_17] : memref<162x24xf32, #tpu.memory_space<vmem>>, vector<142x24xf32>
    %24 = arith.maximumf %22, %23 : vector<142x24xf32>
    %c19 = arith.constant 19 : index
    %c0_18 = arith.constant 0 : index
    %25 = vector.load %arg6[%c19, %c0_18] : memref<162x24xf32, #tpu.memory_space<vmem>>, vector<142x24xf32>
    %26 = arith.maximumf %24, %25 : vector<142x24xf32>
    %c20 = arith.constant 20 : index
    %c0_19 = arith.constant 0 : index
    %27 = vector.load %arg6[%c20, %c0_19] : memref<162x24xf32, #tpu.memory_space<vmem>>, vector<142x24xf32>
    %28 = arith.maximumf %26, %27 : vector<142x24xf32>
    %c0_20 = arith.constant 0 : index
    %c0_21 = arith.constant 0 : index
    %29 = vector.load %arg4[%c0_20, %c0_21] : memref<32x142xf32, #tpu.memory_space<vmem>>, vector<32x142xf32>
    %cst_22 = arith.constant dense<0.000000e+00> : vector<32x24xf32>
    %30 = tpu.matmul %29, %28, %cst_22 {dimension_numbers = #tpu.dot_dimension_numbers<[1], [0], [0], [1], [0, 0, 1, 1], [], []>} : vector<32x142xf32>, vector<142x24xf32>, vector<32x24xf32> -> vector<32x24xf32>
    %c0_23 = arith.constant 0 : index
    %c0_24 = arith.constant 0 : index
    %31 = vector.load %arg5[%c0_23, %c0_24] : memref<32x24xf32, #tpu.memory_space<vmem>>, vector<32x24xf32>
    tpu.vector_store %arg5[%c0_23, %c0_24], %30 {strides = array<i32>} : memref<32x24xf32, #tpu.memory_space<vmem>>, vector<32x24xf32>,
    return
  }
}

</mosaic_0001>

<bundles_post_ra>
// kernel: tpu_custom_call.1
= control target key start
LH: loop header
LB: loop body
LE: loop exit
PB: predicated region body
PF: predicated region fallthrough
CT: control target
= control target key end

     0   :  { %v1010_v0 = vmov 0.0|0.0   ;;  %vm1011_vm0 = vmmov 0   ;;  %v1012_v4 = vmov 0.0   ;;  %v1013_v7 = vmov 0   ;;  %s1352_s1 = inlined_call_operand.vmem [shape: f32[36,24], index: 1, kind: input, shape index: {}]   ;;  %s1353_s3 = inlined_call_operand.vmem [shape: f32[162,1], index: 3, kind: input, shape index: {}]   ;;  %s1354_s0 = inlined_call_operand.vmem [shape: f32[162,36], index: 0, kind: input, shape index: {}]   ;;  %s1355_s4 = inlined_call_operand.vmem [shape: f32[32,142], index: 4, kind: input, shape index: {}]   ;;  %s1356_s2 = inlined_call_operand.vmem [shape: f32[1,24], index: 2, kind: input, shape index: {}]   ;;  %s1357_s5 = inlined_call_operand.vmem [shape: f32[32,24], index: 5, kind: output, shape index: {}]  }
   0x1   :  { %969 = vmatprep.subr.bf16.mxu0 %v1010_v0  ;;  %v41_v1 = vld [vmem:[%s1352_s1] sm:$0xff]  ;;  %v42_v2 = vld [vmem:[%s1352_s1 + $0x8] sm:$0xff]  ;;  %v43_v3 = vld [vmem:[%s1352_s1 + $0x10] sm:$0xff]  ;;  %906 = vmatprep.mubr.msk.f32.mxu0 %vm1011_vm0, %v1012_v4  ;;  %vm117_vm1 = vcmask 1043456   ;;  %vm53_vm2 = vcmask 293888   ;;  %vm732_vm3 = vcmask 113664  }
   0x2   :  { %v970_v5 = vpack.c.bf16 %v42_v2, %v41_v1  ;;  %v44_v6 = vld [vmem:[%s1352_s1 + $0x18] sm:$0xff]  ;;  %1008 = vset.pattern.permute.xlu0 %v1013_v7  ;;  %1009 = vset.pattern.permute.xlu1 %v1013_v7  ;;  %v45_v9 = vld [vmem:[%s1352_s1 + $0x20] sm:$0xf]  ;;  %v314_v12 = vld [vmem:[%s1353_s3 + $0x10] sm:$0xff]  ;;  %vm459_vm4 = vcmask 195584   ;;  %vm480_vm5 = vcmask 189440  }
   0x3   :  { %975 = vmatprep.subr.bf16.mxu1 %v1010_v0  ;;  %v973_v8 = vpack.c.bf16 %v44_v6, %v43_v3  ;;  %v312_v10 = vld [vmem:[%s1353_s3] sm:$0xff]  ;;  %v313_v13 = vld [vmem:[%s1353_s3 + $0x8] sm:$0xff]  ;;  %345 = vperm.xlu1 %1009, %v314_v12   ;;  %v315_v14 = vld [vmem:[%s1353_s3 + $0x18] sm:$0xff]  ;;  %vm745_vm6 = vcmask 1045504   ;;  %vm1014_vm7 = vmmov 1  }
   0x4   :  { %971 = vmatpush3.bf16.msra.mxu0 %v970_v5  ;;  %v20_v11 = vld [vmem:[%s1354_s0] sm:$0xff]  ;;  %335 = vperm.xlu0 %1008, %v312_v10   ;;  %v21_v15 = vld [vmem:[%s1354_s0 + $0x8] sm:$0xff]  ;;  %v22_v18 = vld [vmem:[%s1354_s0 + $0x10] sm:$0xff] }
   0x5   :  { %972 = vmatprep.subr.bf16.mxu0 %v1010_v0  ;;  %v316_v16 = vld [vmem:[%s1353_s3 + $0x20] sm:$0xff]  ;;  %v317_v17 = vld [vmem:[%s1353_s3 + $0x28] sm:$0xff]  ;;  %v318_v19 = vld [vmem:[%s1353_s3 + $0x30] sm:$0xff] }
   0x6   :  { %v319_v20 = vld [vmem:[%s1353_s3 + $0x38] sm:$0xff]  ;;  %v320_v22 = vld [vmem:[%s1353_s3 + $0x40] sm:$0xff]  ;;  %v321_v23 = vld [vmem:[%s1353_s3 + $0x48] sm:$0xff] }
   0x7   :  { %350 = vperm.xlu1 %1009, %v315_v14   ;;  %v23_v21 = vld [vmem:[%s1354_s0 + $0x18] sm:$0xff]  ;;  %v24_v24 = vld [vmem:[%s1354_s0 + $0x20] sm:$0xff]  ;;  %v322_v25 = vld [vmem:[%s1353_s3 + $0x50] sm:$0xff] }
   0x8   :  { %974 = vmatpush3.bf16.msra.mxu0 %v973_v8  ;;  %340 = vperm.xlu0 %1008, %v313_v13   ;;  %v323_v26 = vld [vmem:[%s1353_s3 + $0x58] sm:$0xff]  ;;  %v25_v27 = vld [vmem:[%s1354_s0 + $0x28] sm:$0xff]  ;;  %v324_v28 = vld [vmem:[%s1353_s3 + $0x60] sm:$0xff] }
   0x9   :  { %904 = vmatprep.subr.mxu0 %v1012_v4  ;;  %v325_v29 = vld [vmem:[%s1353_s3 + $0x68] sm:$0xff]  ;;  %v26_v30 = vld [vmem:[%s1354_s0 + $0x30] sm:$0xff]  ;;  %v327_v32 = vld [vmem:[%s1353_s3 + $0x78] sm:$0xff] }
   0xa   :  { %v326_v31 = vld [vmem:[%s1353_s3 + $0x70] sm:$0xff]  ;;  %v27_v33 = vld [vmem:[%s1354_s0 + $0x38] sm:$0xff]  ;;  %v328_v34 = vld [vmem:[%s1353_s3 + $0x80] sm:$0xff] }
   0xb   :  { %360 = vperm.xlu1 %1009, %v317_v17   ;;  %v329_v35 = vld [vmem:[%s1353_s3 + $0x88] sm:$0xff]  ;;  %v28_v36 = vld [vmem:[%s1354_s0 + $0x40] sm:$0xff]  ;;  %v330_v37 = vld [vmem:[%s1353_s3 + $0x90] sm:$0xff] }
   0xc   :  { %905 = vmatpush3.msk.msra.mxu0 %vm117_vm1, %v45_v9  ;;  %355 = vperm.xlu0 %1008, %v316_v16   ;;  %v331_v38 = vld [vmem:[%s1353_s3 + $0x98] sm:$0xff]  ;;  %v29_v39 = vld [vmem:[%s1354_s0 + $0x48] sm:$0xff]  ;;  %v332_v40 = vld [vmem:[%s1353_s3 + $0xa0] sm:$0x3] }
   0xd   :  { %907 = vmatmul.mubr.msk.f32.vlgmr.msra.gmra.mrb[0].mxu0 %vm53_vm2, %v20_v11  ;;  %v30_v41 = vld [vmem:[%s1354_s0 + $0x50] sm:$0xff]  ;;  %v31_v42 = vld [vmem:[%s1354_s0 + $0x58] sm:$0xff]  ;;  %v32_v43 = vld [vmem:[%s1354_s0 + $0x60] sm:$0xff] }
   0xe   :  { %909 = vmatprep.mubr.msk.f32.mxu0 %vm1011_vm0, %v1012_v4  ;;  %v33_v44 = vld [vmem:[%s1354_s0 + $0x68] sm:$0xff]  ;;  %v34_v45 = vld [vmem:[%s1354_s0 + $0x70] sm:$0xff]  ;;  %v35_v46 = vld [vmem:[%s1354_s0 + $0x78] sm:$0xff] }
   0xf   :  { %370 = vperm.xlu1 %1009, %v319_v20   ;;  %v36_v47 = vld [vmem:[%s1354_s0 + $0x80] sm:$0xff]  ;;  %v37_v48 = vld [vmem:[%s1354_s0 + $0x88] sm:$0xff]  ;;  %v38_v49 = vld [vmem:[%s1354_s0 + $0x90] sm:$0xff] }
  0x10   :  { %365 = vperm.xlu0 %1008, %v318_v19   ;;  %v39_v50 = vld [vmem:[%s1354_s0 + $0x98] sm:$0xff]  ;;  %v40_v51 = vld [vmem:[%s1354_s0 + $0xa0] sm:$0x3]  ;;  %v725_v52 = vld [vmem:[%s1355_s4 + $0x8] sm:$0xff] }
  0x11   :  { %910 = vmatmul.mubr.msk.f32.gmra.mrb[2].mxu0 %vm53_vm2, %v21_v15  ;;  %866 = vmatprep.mubr.msk.f32.mxu1 %vm732_vm3, %v725_v52  ;;  %v1260_v53 = vld [vmem:[%s1356_s2] ss:$0 sm:$0xff]  ;;  %vm1001_vm8 = vmpackc.low %vm745_vm6, %vm1014_vm7 }
  0x12   :  { %912 = vmatprep.mubr.msk.f32.mxu0 %vm1011_vm0, %v1012_v4 }
  0x13   :  { %380 = vperm.xlu1 %1009, %v321_v23  }
  0x14   :  { %375 = vperm.xlu0 %1008, %v320_v22  }
  0x15   :  { %913 = vmatmul.mubr.msk.f32.gmra.mrb[4].mxu0 %vm53_vm2, %v22_v18 }
  0x16   :  { %915 = vmatprep.mubr.msk.f32.mxu0 %vm1011_vm0, %v1012_v4 }
  0x17   :  { %390 = vperm.xlu1 %1009, %v323_v26  }
  0x18   :  { %385 = vperm.xlu0 %1008, %v322_v25  }
  0x19   :  { %916 = vmatmul.mubr.msk.f32.gmra.mrb[6].mxu0 %vm53_vm2, %v23_v21 }
  0x1a   :  { %918 = vmatprep.mubr.msk.f32.mxu0 %vm1011_vm0, %v1012_v4 }
  0x1b   :  { %400 = vperm.xlu1 %1009, %v325_v29  }
  0x1c   :  { %395 = vperm.xlu0 %1008, %v324_v28  }
  0x1d   :  { %919 = vmatmul.mubr.msk.f32.gmra.mrb[8].mxu0 %vm53_vm2, %v24_v24 }
  0x1e   :  { %921 = vmatprep.mubr.msk.f32.mxu0 %vm1011_vm0, %v1012_v4 }
  0x1f   :  { %410 = vperm.xlu1 %1009, %v327_v32  }
  0x20   :  { %405 = vperm.xlu0 %1008, %v326_v31  }
  0x21   :  { %922 = vmatmul.mubr.msk.f32.gmra.mrb[10].mxu0 %vm53_vm2, %v25_v27 }
  0x22   :  { %924 = vmatprep.mubr.msk.f32.mxu0 %vm1011_vm0, %v1012_v4 }
  0x23   :  { %420 = vperm.xlu1 %1009, %v329_v35  }
  0x24   :  { %415 = vperm.xlu0 %1008, %v328_v34  }
  0x25   :  { %925 = vmatmul.mubr.msk.f32.gmra.mrb[12].mxu0 %vm53_vm2, %v26_v30 }
  0x26   :  { %927 = vmatprep.mubr.msk.f32.mxu0 %vm1011_vm0, %v1012_v4 }
  0x27   :  { %430 = vperm.xlu1 %1009, %v331_v38  }
  0x28   :  { %425 = vperm.xlu0 %1008, %v330_v37  }
  0x29   :  { %928 = vmatmul.mubr.msk.f32.gmra.mrb[14].mxu0 %vm53_vm2, %v27_v33 }
  0x2a   :  { %930 = vmatprep.mubr.msk.f32.mxu0 %vm1011_vm0, %v1012_v4 }
  0x2c   :  { %435 = vperm.xlu0 %1008, %v332_v40  }
  0x2d   :  { %931 = vmatmul.mubr.msk.f32.gmra.mrb[16].mxu0 %vm53_vm2, %v28_v36 }
  0x2e   :  { %933 = vmatprep.mubr.msk.f32.mxu0 %vm1011_vm0, %v1012_v4 }
  0x31   :  { %934 = vmatmul.mubr.msk.f32.gmra.mrb[18].mxu0 %vm53_vm2, %v29_v39 }
  0x32   :  { %936 = vmatprep.mubr.msk.f32.mxu0 %vm1011_vm0, %v1012_v4 }
  0x35   :  { %937 = vmatmul.mubr.msk.f32.gmra.mrb[20].mxu0 %vm53_vm2, %v30_v41 }
  0x36   :  { %939 = vmatprep.mubr.msk.f32.mxu0 %vm1011_vm0, %v1012_v4 }
  0x39   :  { %940 = vmatmul.mubr.msk.f32.gmra.mrb[22].mxu0 %vm53_vm2, %v31_v42 }
  0x3a   :  { %942 = vmatprep.mubr.msk.f32.mxu0 %vm1011_vm0, %v1012_v4 }
  0x3d   :  { %943 = vmatmul.mubr.msk.f32.gmra.mrb[24].mxu0 %vm53_vm2, %v32_v43 }
  0x3e   :  { %945 = vmatprep.mubr.msk.f32.mxu0 %vm1011_vm0, %v1012_v4 }
  0x41   :  { %946 = vmatmul.mubr.msk.f32.gmra.mrb[26].mxu0 %vm53_vm2, %v33_v44 }
  0x42   :  { %948 = vmatprep.mubr.msk.f32.mxu0 %vm1011_vm0, %v1012_v4 }
  0x45   :  { %949 = vmatmul.mubr.msk.f32.gmra.mrb[28].mxu0 %vm53_vm2, %v34_v45 }
  0x46   :  { %951 = vmatprep.mubr.msk.f32.mxu0 %vm1011_vm0, %v1012_v4 }
  0x49   :  { %952 = vmatmul.mubr.msk.f32.gmra.mrb[30].mxu0 %vm53_vm2, %v35_v46 }
  0x4a   :  { %954 = vmatprep.mubr.msk.f32.mxu0 %vm1011_vm0, %v1012_v4 }
  0x4d   :  { %955 = vmatmul.mubr.msk.f32.gmra.mrb[32].mxu0 %vm53_vm2, %v36_v47 }
  0x4e   :  { %957 = vmatprep.mubr.msk.f32.mxu0 %vm1011_vm0, %v1012_v4 }
  0x51   :  { %958 = vmatmul.mubr.msk.f32.gmra.mrb[34].mxu0 %vm53_vm2, %v37_v48 }
  0x52   :  { %960 = vmatprep.mubr.msk.f32.mxu0 %vm1011_vm0, %v1012_v4 }
  0x55   :  { %961 = vmatmul.mubr.msk.f32.gmra.mrb[36].mxu0 %vm53_vm2, %v38_v49 }
  0x56   :  { %963 = vmatprep.mubr.msk.f32.mxu0 %vm1011_vm0, %v1012_v4 }
  0x59   :  { %964 = vmatmul.mubr.msk.f32.gmra.mrb[38].mxu0 %vm53_vm2, %v39_v50 }
  0x5a   :  { %966 = vmatprep.mubr.msk.f32.mxu0 %vm1011_vm0, %v1012_v4 }
  0x5d   :  { %967 = vmatmul.mubr.msk.f32.gmra.mrb[40].mxu0 %vm53_vm2, %v40_v51 }
  0x82   :  { %v346_v6 = vpop.permute.xlu1 %345 }
  0x83   :  { %v336_v57 = vpop.permute.xlu0 %335 }
  0x86   :  { %v351_v13 = vpop.permute.xlu1 %350 }
  0x87   :  { %v341_v1 = vpop.permute.xlu0 %340 }
  0x8a   :  { %v361_v34 = vpop.permute.xlu1 %360 }
  0x8b   :  { %v356_v22 = vpop.permute.xlu0 %355 }
  0x8f   :  { %v366_v49 = vpop.permute.xlu0 %365 }
  0xe0   :  { %v187_v54 = vpop.f32.mrb[0].mxu0 }
  0xe1   :  { %v188_v55 = vadd.f32 %v1260_v53, %v187_v54  ;;  %v908_v56 = vpop.f32.mrb[1].mxu0 }
  0xe3   :  { %v291_v58 = vmax.f32 %v188_v55, 0.0 }
  0xe4   :  { %v192_v59 = vpop.f32.mrb[2].mxu0 }
  0xe5   :  { %v438_v60 = vmul.f32 %v336_v57, %v291_v58  ;;  %v193_v61 = vadd.f32 %v1260_v53, %v192_v59  ;;  %v911_v62 = vpop.f32.mrb[3].mxu0 }
  0xe7   :  { %460 = vst.msk [vmem:[#allocation2] sm:$0xff] %vm459_vm4, %v438_v60  ;;  %v292_v63 = vmax.f32 %v193_v61, 0.0 }
  0xe8   :  { %v197_v2 = vpop.f32.mrb[4].mxu0 }
  0xe9   :  { %v439_v3 = vmul.f32 %v341_v1, %v292_v63  ;;  %v198_v4 = vadd.f32 %v1260_v53, %v197_v2  ;;  %v914_v5 = vpop.f32.mrb[5].mxu0 }
  0xeb   :  { %461 = vst.msk [vmem:[#allocation2 + $0x8] sm:$0xff] %vm459_vm4, %v439_v3  ;;  %v293_v7 = vmax.f32 %v198_v4, 0.0  ;;  %v371_v3 = vpop.permute.xlu1 %370 }
  0xec   :  { %v202_v8 = vpop.f32.mrb[6].mxu0 }
  0xed   :  { %v440_v9 = vmul.f32 %v346_v6, %v293_v7  ;;  %v203_v10 = vadd.f32 %v1260_v53, %v202_v8  ;;  %v917_v11 = vpop.f32.mrb[7].mxu0 }
  0xee   :  { %v482_v18 = vld [vmem:[#allocation2] sm:$0xff] }
  0xef   :  { %462 = vst.msk [vmem:[#allocation2 + $0x10] sm:$0xff] %vm459_vm4, %v440_v9  ;;  %v294_v12 = vmax.f32 %v203_v10, 0.0 }
  0xf0   :  { %v207_v14 = vpop.f32.mrb[8].mxu0 }
  0xf1   :  { %v441_v15 = vmul.f32 %v351_v13, %v294_v12  ;;  %v208_v16 = vadd.f32 %v1260_v53, %v207_v14  ;;  %v920_v17 = vpop.f32.mrb[9].mxu0 }
  0xf2   :  { %v500_v19 = vld [vmem:[#allocation2 + $0x1] sm:$0xff] }
  0xf3   :  { %463 = vst.msk [vmem:[#allocation2 + $0x18] sm:$0xff] %vm459_vm4, %v441_v15  ;;  %v295_v20 = vmax.f32 %v208_v16, 0.0  ;;  %v518_v21 = vmax.f32 %v482_v18, %v500_v19  ;;  %v536_v24 = vld [vmem:[#allocation2 + $0x2] sm:$0xff] }
  0xf4   :  { %v212_v23 = vpop.f32.mrb[10].mxu0  ;;  %v483_v29 = vld [vmem:[#allocation2 + $0x8] sm:$0xff] }
  0xf5   :  { %v442_v25 = vmul.f32 %v356_v22, %v295_v20  ;;  %v213_v26 = vadd.f32 %v1260_v53, %v212_v23  ;;  %v923_v27 = vpop.f32.mrb[11].mxu0  ;;  %v554_v28 = vmax.f32 %v518_v21, %v536_v24  ;;  %v376_v20 = vpop.permute.xlu0 %375 }
  0xf6   :  { %v501_v30 = vld [vmem:[#allocation2 + $0x9] sm:$0xff] }
  0xf7   :  { %464 = vst.msk [vmem:[#allocation2 + $0x20] sm:$0xff] %vm459_vm4, %v442_v25  ;;  %v296_v31 = vmax.f32 %v213_v26, 0.0  ;;  %v519_v32 = vmax.f32 %v483_v29, %v501_v30  ;;  %v574_v33 = vmax.f32 %v554_v28, %v501_v30  ;;  %v537_v36 = vld [vmem:[#allocation2 + $0xa] sm:$0xff] }
  0xf8   :  { %v217_v35 = vpop.f32.mrb[12].mxu0  ;;  %v484_v42 = vld [vmem:[#allocation2 + $0x10] sm:$0xff] }
  0xf9   :  { %v443_v37 = vmul.f32 %v361_v34, %v296_v31  ;;  %v218_v38 = vadd.f32 %v1260_v53, %v217_v35  ;;  %v926_v39 = vpop.f32.mrb[13].mxu0  ;;  %v555_v40 = vmax.f32 %v519_v32, %v537_v36  ;;  %v594_v41 = vmax.f32 %v574_v33, %v537_v36  ;;  %v612_v44 = vld [vmem:[#allocation2 + $0xb] sm:$0xff] }
  0xfa   :  { %v502_v43 = vld [vmem:[#allocation2 + $0x11] sm:$0xff] }
  0xfb   :  { %465 = vst.msk [vmem:[#allocation2 + $0x28] sm:$0xff] %vm459_vm4, %v443_v37  ;;  %v297_v45 = vmax.f32 %v218_v38, 0.0  ;;  %v520_v46 = vmax.f32 %v484_v42, %v502_v43  ;;  %v575_v47 = vmax.f32 %v555_v40, %v502_v43  ;;  %v630_v48 = vmax.f32 %v594_v41, %v612_v44  ;;  %v538_v51 = vld [vmem:[#allocation2 + $0x12] sm:$0xff]  ;;  %v381_v40 = vpop.permute.xlu1 %380 }
  0xfc   :  { %v222_v50 = vpop.f32.mrb[14].mxu0  ;;  %v485_v58 = vld [vmem:[#allocation2 + $0x18] sm:$0xff] }
  0xfd   :  { %v444_v52 = vmul.f32 %v366_v49, %v297_v45  ;;  %v223_v54 = vadd.f32 %v1260_v53, %v222_v50  ;;  %v929_v55 = vpop.f32.mrb[15].mxu0  ;;  %v556_v56 = vmax.f32 %v520_v46, %v538_v51  ;;  %v595_v57 = vmax.f32 %v575_v47, %v538_v51  ;;  %v613_v60 = vld [vmem:[#allocation2 + $0x13] sm:$0xff] }
  0xfe   :  { %v503_v59 = vld [vmem:[#allocation2 + $0x19] sm:$0xff]  ;;  %v650_v61 = vmax.f32 %v630_v48, %v538_v51 }
  0xff   :  { %466 = vst.msk [vmem:[#allocation2 + $0x30] sm:$0xff] %vm459_vm4, %v444_v52  ;;  %v298_v62 = vmax.f32 %v223_v54, 0.0  ;;  %v521_v63 = vmax.f32 %v485_v58, %v503_v59  ;;  %v576_v1 = vmax.f32 %v556_v56, %v503_v59  ;;  %v631_v2 = vmax.f32 %v595_v57, %v613_v60  ;;  %v539_v5 = vld [vmem:[#allocation2 + $0x1a] sm:$0xff] }
 0x100   :  { %v227_v4 = vpop.f32.mrb[16].mxu0  ;;  %v486_v11 = vld [vmem:[#allocation2 + $0x20] sm:$0xff]  ;;  %v670_v15 = vmax.f32 %v650_v61, %v613_v60  ;;  %v688_v28 = vld [vmem:[#allocation2 + $0x14] sm:$0xff]  ;;  %v386_v60 = vpop.permute.xlu0 %385 }
 0x101   :  { %v445_v6 = vmul.f32 %v371_v3, %v298_v62  ;;  %v228_v7 = vadd.f32 %v1260_v53, %v227_v4  ;;  %v932_v8 = vpop.f32.mrb[17].mxu0  ;;  %v557_v9 = vmax.f32 %v521_v63, %v539_v5  ;;  %v596_v10 = vmax.f32 %v576_v1, %v539_v5  ;;  %v614_v13 = vld [vmem:[#allocation2 + $0x1b] sm:$0xff] }
 0x102   :  { %v504_v12 = vld [vmem:[#allocation2 + $0x21] sm:$0xff]  ;;  %v651_v14 = vmax.f32 %v631_v2, %v539_v5  ;;  %v706_v31 = vmax.f32 %v670_v15, %v688_v28 }
 0x103   :  { %467 = vst.msk [vmem:[#allocation2 + $0x38] sm:$0xff] %vm459_vm4, %v445_v6  ;;  %v299_v16 = vmax.f32 %v228_v7, 0.0  ;;  %v522_v17 = vmax.f32 %v486_v11, %v504_v12  ;;  %v632_v18 = vmax.f32 %v596_v10, %v614_v13  ;;  %v577_v19 = vmax.f32 %v557_v9, %v504_v12  ;;  %v540_v22 = vld [vmem:[#allocation2 + $0x22] sm:$0xff] }
 0x104   :  { %v232_v21 = vpop.f32.mrb[18].mxu0  ;;  %v671_v23 = vmax.f32 %v651_v14, %v614_v13  ;;  %v689_v29 = vld [vmem:[#allocation2 + $0x1c] sm:$0xff]  ;;  %v487_v33 = vld [vmem:[#allocation2 + $0x28] sm:$0xff] }
 0x105   :  { %v446_v24 = vmul.f32 %v376_v20, %v299_v16  ;;  %v233_v25 = vadd.f32 %v1260_v53, %v232_v21  ;;  %v935_v26 = vpop.f32.mrb[19].mxu0  ;;  %v558_v27 = vmax.f32 %v522_v17, %v540_v22  ;;  %v652_v30 = vmax.f32 %v632_v18, %v540_v22  ;;  %v615_v39 = vld [vmem:[#allocation2 + $0x23] sm:$0xff]  ;;  %v391_v18 = vpop.permute.xlu1 %390 }
 0x106   :  { %v707_v32 = vmax.f32 %v671_v23, %v689_v29  ;;  %v505_v34 = vld [vmem:[#allocation2 + $0x29] sm:$0xff]  ;;  %v597_v35 = vmax.f32 %v577_v19, %v540_v22 }
 0x107   :  { %468 = vst.msk [vmem:[#allocation2 + $0x40] sm:$0xff] %vm459_vm4, %v446_v24  ;;  %v300_v36 = vmax.f32 %v233_v25, 0.0  ;;  %v523_v37 = vmax.f32 %v487_v33, %v505_v34  ;;  %v578_v38 = vmax.f32 %v558_v27, %v505_v34  ;;  %v541_v43 = vld [vmem:[#allocation2 + $0x2a] sm:$0xff]  ;;  %v672_v52 = vmax.f32 %v652_v30, %v615_v39 }
 0x108   :  { %v237_v41 = vpop.f32.mrb[20].mxu0  ;;  %v976_v42 = vpack.c.bf16 %v707_v32, %v706_v31  ;;  %v633_v44 = vmax.f32 %v597_v35, %v615_v39  ;;  %v616_v50 = vld [vmem:[#allocation2 + $0x2b] sm:$0xff] }
 0x109   :  { %v447_v45 = vmul.f32 %v381_v40, %v300_v36  ;;  %v238_v46 = vadd.f32 %v1260_v53, %v237_v41  ;;  %v938_v47 = vpop.f32.mrb[21].mxu0  ;;  %v559_v48 = vmax.f32 %v523_v37, %v541_v43  ;;  %v598_v49 = vmax.f32 %v578_v38, %v541_v43  ;;  %v488_v54 = vld [vmem:[#allocation2 + $0x30] sm:$0xff]  ;;  %v690_v4 = vld [vmem:[#allocation2 + $0x24] sm:$0xff]  ;;  %v396_v36 = vpop.permute.xlu0 %395 }
 0x10a   :  { %977 = vmatpush1.bf16.msra.mxu1 %v976_v42  ;;  %v653_v51 = vmax.f32 %v633_v44, %v541_v43  ;;  %v506_v55 = vld [vmem:[#allocation2 + $0x31] sm:$0xff]  ;;  %v708_v8 = vmax.f32 %v672_v52, %v690_v4 }
 0x10b   :  { %469 = vst.msk [vmem:[#allocation2 + $0x48] sm:$0xff] %vm459_vm4, %v447_v45  ;;  %v301_v56 = vmax.f32 %v238_v46, 0.0  ;;  %978 = vmatprep.subr.bf16.mxu1 %v1010_v0  ;;  %v634_v57 = vmax.f32 %v598_v49, %v616_v50  ;;  %v524_v58 = vmax.f32 %v488_v54, %v506_v55  ;;  %v579_v59 = vmax.f32 %v559_v48, %v506_v55  ;;  %v542_v63 = vld [vmem:[#allocation2 + $0x32] sm:$0xff] }
 0x10c   :  { %v242_v61 = vpop.f32.mrb[22].mxu0  ;;  %v673_v62 = vmax.f32 %v653_v51, %v616_v50  ;;  %v691_v5 = vld [vmem:[#allocation2 + $0x2c] sm:$0xff]  ;;  %v489_v10 = vld [vmem:[#allocation2 + $0x38] sm:$0xff] }
 0x10d   :  { %v448_v1 = vmul.f32 %v386_v60, %v301_v56  ;;  %v243_v2 = vadd.f32 %v1260_v53, %v242_v61  ;;  %v941_v3 = vpop.f32.mrb[23].mxu0  ;;  %v560_v6 = vmax.f32 %v524_v58, %v542_v63  ;;  %v599_v7 = vmax.f32 %v579_v59, %v542_v63  ;;  %v617_v12 = vld [vmem:[#allocation2 + $0x33] sm:$0xff]  ;;  %v401_v58 = vpop.permute.xlu1 %400 }
 0x10e   :  { %v709_v9 = vmax.f32 %v673_v62, %v691_v5  ;;  %v507_v11 = vld [vmem:[#allocation2 + $0x39] sm:$0xff]  ;;  %v654_v13 = vmax.f32 %v634_v57, %v542_v63 }
 0x10f   :  { %470 = vst.msk [vmem:[#allocation2 + $0x50] sm:$0xff] %vm459_vm4, %v448_v1  ;;  %v302_v14 = vmax.f32 %v243_v2, 0.0  ;;  %v525_v15 = vmax.f32 %v489_v10, %v507_v11  ;;  %v580_v16 = vmax.f32 %v560_v6, %v507_v11  ;;  %v635_v17 = vmax.f32 %v599_v7, %v617_v12  ;;  %v543_v21 = vld [vmem:[#allocation2 + $0x3a] sm:$0xff] }
 0x110   :  { %v247_v19 = vpop.f32.mrb[24].mxu0  ;;  %v979_v20 = vpack.c.bf16 %v709_v9, %v708_v8  ;;  %v618_v27 = vld [vmem:[#allocation2 + $0x3b] sm:$0xff]  ;;  %v674_v29 = vmax.f32 %v654_v13, %v617_v12  ;;  %v406_v13 = vpop.permute.xlu0 %405 }
 0x111   :  { %v449_v22 = vmul.f32 %v391_v18, %v302_v14  ;;  %v248_v23 = vadd.f32 %v1260_v53, %v247_v19  ;;  %v944_v24 = vpop.f32.mrb[25].mxu0  ;;  %v561_v25 = vmax.f32 %v525_v15, %v543_v21  ;;  %v600_v26 = vmax.f32 %v580_v16, %v543_v21  ;;  %v490_v30 = vld [vmem:[#allocation2 + $0x40] sm:$0xff]  ;;  %v692_v43 = vld [vmem:[#allocation2 + $0x34] sm:$0xff] }
 0x112   :  { %980 = vmatpush1.bf16.msra.mxu1 %v979_v20  ;;  %v655_v28 = vmax.f32 %v635_v17, %v543_v21  ;;  %v508_v31 = vld [vmem:[#allocation2 + $0x41] sm:$0xff]  ;;  %v710_v47 = vmax.f32 %v674_v29, %v692_v43 }
 0x113   :  { %471 = vst.msk [vmem:[#allocation2 + $0x58] sm:$0xff] %vm459_vm4, %v449_v22  ;;  %v303_v32 = vmax.f32 %v248_v23, 0.0  ;;  %981 = vmatprep.subr.bf16.mxu1 %v1010_v0  ;;  %v636_v33 = vmax.f32 %v600_v26, %v618_v27  ;;  %v526_v34 = vmax.f32 %v490_v30, %v508_v31  ;;  %v581_v35 = vmax.f32 %v561_v25, %v508_v31  ;;  %v544_v39 = vld [vmem:[#allocation2 + $0x42] sm:$0xff] }
 0x114   :  { %v252_v37 = vpop.f32.mrb[26].mxu0  ;;  %v675_v38 = vmax.f32 %v655_v28, %v618_v27  ;;  %v693_v44 = vld [vmem:[#allocation2 + $0x3c] sm:$0xff]  ;;  %v491_v49 = vld [vmem:[#allocation2 + $0x48] sm:$0xff] }
 0x115   :  { %v450_v40 = vmul.f32 %v396_v36, %v303_v32  ;;  %v253_v41 = vadd.f32 %v1260_v53, %v252_v37  ;;  %v947_v42 = vpop.f32.mrb[27].mxu0  ;;  %v562_v45 = vmax.f32 %v526_v34, %v544_v39  ;;  %v601_v46 = vmax.f32 %v581_v35, %v544_v39  ;;  %v619_v51 = vld [vmem:[#allocation2 + $0x43] sm:$0xff]  ;;  %v411_v34 = vpop.permute.xlu1 %410 }
 0x116   :  { %v711_v48 = vmax.f32 %v675_v38, %v693_v44  ;;  %v509_v50 = vld [vmem:[#allocation2 + $0x49] sm:$0xff]  ;;  %v656_v52 = vmax.f32 %v636_v33, %v544_v39 }
 0x117   :  { %472 = vst.msk [vmem:[#allocation2 + $0x60] sm:$0xff] %vm459_vm4, %v450_v40  ;;  %v304_v54 = vmax.f32 %v253_v41, 0.0  ;;  %v527_v55 = vmax.f32 %v491_v49, %v509_v50  ;;  %v582_v56 = vmax.f32 %v562_v45, %v509_v50  ;;  %v637_v57 = vmax.f32 %v601_v46, %v619_v51  ;;  %v545_v61 = vld [vmem:[#allocation2 + $0x4a] sm:$0xff] }
 0x118   :  { %v257_v59 = vpop.f32.mrb[28].mxu0  ;;  %v982_v60 = vpack.c.bf16 %v711_v48, %v710_v47  ;;  %v620_v4 = vld [vmem:[#allocation2 + $0x4b] sm:$0xff]  ;;  %v676_v6 = vmax.f32 %v656_v52, %v619_v51  ;;  %v416_v52 = vpop.permute.xlu0 %415 }
 0x119   :  { %v451_v62 = vmul.f32 %v401_v58, %v304_v54  ;;  %v258_v63 = vadd.f32 %v1260_v53, %v257_v59  ;;  %v950_v1 = vpop.f32.mrb[29].mxu0  ;;  %v563_v2 = vmax.f32 %v527_v55, %v545_v61  ;;  %v602_v3 = vmax.f32 %v582_v56, %v545_v61  ;;  %v492_v7 = vld [vmem:[#allocation2 + $0x50] sm:$0xff]  ;;  %v694_v20 = vld [vmem:[#allocation2 + $0x44] sm:$0xff] }
 0x11a   :  { %983 = vmatpush1.bf16.msra.mxu1 %v982_v60  ;;  %v657_v5 = vmax.f32 %v637_v57, %v545_v61  ;;  %v510_v8 = vld [vmem:[#allocation2 + $0x51] sm:$0xff]  ;;  %v712_v24 = vmax.f32 %v676_v6, %v694_v20 }
 0x11b   :  { %473 = vst.msk [vmem:[#allocation2 + $0x68] sm:$0xff] %vm459_vm4, %v451_v62  ;;  %v305_v9 = vmax.f32 %v258_v63, 0.0  ;;  %984 = vmatprep.subr.bf16.mxu1 %v1010_v0  ;;  %v638_v10 = vmax.f32 %v602_v3, %v620_v4  ;;  %v528_v11 = vmax.f32 %v492_v7, %v510_v8  ;;  %v583_v12 = vmax.f32 %v563_v2, %v510_v8  ;;  %v546_v16 = vld [vmem:[#allocation2 + $0x52] sm:$0xff] }
 0x11c   :  { %v262_v14 = vpop.f32.mrb[30].mxu0  ;;  %v677_v15 = vmax.f32 %v657_v5, %v620_v4  ;;  %v695_v21 = vld [vmem:[#allocation2 + $0x4c] sm:$0xff]  ;;  %v493_v26 = vld [vmem:[#allocation2 + $0x58] sm:$0xff] }
 0x11d   :  { %v452_v17 = vmul.f32 %v406_v13, %v305_v9  ;;  %v263_v18 = vadd.f32 %v1260_v53, %v262_v14  ;;  %v953_v19 = vpop.f32.mrb[31].mxu0  ;;  %v564_v22 = vmax.f32 %v528_v11, %v546_v16  ;;  %v603_v23 = vmax.f32 %v583_v12, %v546_v16  ;;  %v621_v28 = vld [vmem:[#allocation2 + $0x53] sm:$0xff]  ;;  %v421_v11 = vpop.permute.xlu1 %420 }
 0x11e   :  { %v713_v25 = vmax.f32 %v677_v15, %v695_v21  ;;  %v511_v27 = vld [vmem:[#allocation2 + $0x59] sm:$0xff]  ;;  %v658_v29 = vmax.f32 %v638_v10, %v546_v16 }
 0x11f   :  { %474 = vst.msk [vmem:[#allocation2 + $0x70] sm:$0xff] %vm459_vm4, %v452_v17  ;;  %v306_v30 = vmax.f32 %v263_v18, 0.0  ;;  %v529_v31 = vmax.f32 %v493_v26, %v511_v27  ;;  %v584_v32 = vmax.f32 %v564_v22, %v511_v27  ;;  %v639_v33 = vmax.f32 %v603_v23, %v621_v28  ;;  %v547_v37 = vld [vmem:[#allocation2 + $0x5a] sm:$0xff] }
 0x120   :  { %v267_v35 = vpop.f32.mrb[32].mxu0  ;;  %v985_v36 = vpack.c.bf16 %v713_v25, %v712_v24  ;;  %v622_v43 = vld [vmem:[#allocation2 + $0x5b] sm:$0xff]  ;;  %v678_v45 = vmax.f32 %v658_v29, %v621_v28  ;;  %v426_v29 = vpop.permute.xlu0 %425 }
 0x121   :  { %v453_v38 = vmul.f32 %v411_v34, %v306_v30  ;;  %v268_v39 = vadd.f32 %v1260_v53, %v267_v35  ;;  %v956_v40 = vpop.f32.mrb[33].mxu0  ;;  %v565_v41 = vmax.f32 %v529_v31, %v547_v37  ;;  %v604_v42 = vmax.f32 %v584_v32, %v547_v37  ;;  %v494_v46 = vld [vmem:[#allocation2 + $0x60] sm:$0xff]  ;;  %v696_v60 = vld [vmem:[#allocation2 + $0x54] sm:$0xff] }
 0x122   :  { %986 = vmatpush1.bf16.msra.mxu1 %v985_v36  ;;  %v659_v44 = vmax.f32 %v639_v33, %v547_v37  ;;  %v512_v47 = vld [vmem:[#allocation2 + $0x61] sm:$0xff]  ;;  %v714_v1 = vmax.f32 %v678_v45, %v696_v60 }
 0x123   :  { %475 = vst.msk [vmem:[#allocation2 + $0x78] sm:$0xff] %vm459_vm4, %v453_v38  ;;  %v307_v48 = vmax.f32 %v268_v39, 0.0  ;;  %987 = vmatprep.subr.bf16.mxu1 %v1010_v0  ;;  %v640_v49 = vmax.f32 %v604_v42, %v622_v43  ;;  %v530_v50 = vmax.f32 %v494_v46, %v512_v47  ;;  %v585_v51 = vmax.f32 %v565_v41, %v512_v47  ;;  %v548_v56 = vld [vmem:[#allocation2 + $0x62] sm:$0xff] }
 0x124   :  { %v272_v54 = vpop.f32.mrb[34].mxu0  ;;  %v679_v55 = vmax.f32 %v659_v44, %v622_v43  ;;  %v697_v61 = vld [vmem:[#allocation2 + $0x5c] sm:$0xff]  ;;  %v495_v3 = vld [vmem:[#allocation2 + $0x68] sm:$0xff] }
 0x125   :  { %v454_v57 = vmul.f32 %v416_v52, %v307_v48  ;;  %v273_v58 = vadd.f32 %v1260_v53, %v272_v54  ;;  %v959_v59 = vpop.f32.mrb[35].mxu0  ;;  %v566_v62 = vmax.f32 %v530_v50, %v548_v56  ;;  %v605_v63 = vmax.f32 %v585_v51, %v548_v56  ;;  %v623_v5 = vld [vmem:[#allocation2 + $0x63] sm:$0xff]  ;;  %v431_v50 = vpop.permute.xlu1 %430 }
 0x126   :  { %v715_v2 = vmax.f32 %v679_v55, %v697_v61  ;;  %v513_v4 = vld [vmem:[#allocation2 + $0x69] sm:$0xff]  ;;  %v660_v6 = vmax.f32 %v640_v49, %v548_v56 }
 0x127   :  { %476 = vst.msk [vmem:[#allocation2 + $0x80] sm:$0xff] %vm459_vm4, %v454_v57  ;;  %v308_v7 = vmax.f32 %v273_v58, 0.0  ;;  %v531_v8 = vmax.f32 %v495_v3, %v513_v4  ;;  %v586_v9 = vmax.f32 %v566_v62, %v513_v4  ;;  %v641_v10 = vmax.f32 %v605_v63, %v623_v5  ;;  %v549_v14 = vld [vmem:[#allocation2 + $0x6a] sm:$0xff] }
 0x128   :  { %v277_v12 = vpop.f32.mrb[36].mxu0  ;;  %v988_v13 = vpack.c.bf16 %v715_v2, %v714_v1  ;;  %v624_v20 = vld [vmem:[#allocation2 + $0x6b] sm:$0xff]  ;;  %v680_v22 = vmax.f32 %v660_v6, %v623_v5 }
 0x129   :  { %v455_v15 = vmul.f32 %v421_v11, %v308_v7  ;;  %v278_v16 = vadd.f32 %v1260_v53, %v277_v12  ;;  %v962_v17 = vpop.f32.mrb[37].mxu0  ;;  %v567_v18 = vmax.f32 %v531_v8, %v549_v14  ;;  %v606_v19 = vmax.f32 %v586_v9, %v549_v14  ;;  %v496_v23 = vld [vmem:[#allocation2 + $0x70] sm:$0xff]  ;;  %v698_v36 = vld [vmem:[#allocation2 + $0x64] sm:$0xff] }
 0x12a   :  { %989 = vmatpush1.bf16.msra.mxu1 %v988_v13  ;;  %v661_v21 = vmax.f32 %v641_v10, %v549_v14  ;;  %v514_v24 = vld [vmem:[#allocation2 + $0x71] sm:$0xff]  ;;  %v716_v40 = vmax.f32 %v680_v22, %v698_v36 }
 0x12b   :  { %477 = vst.msk [vmem:[#allocation2 + $0x88] sm:$0xff] %vm459_vm4, %v455_v15  ;;  %v309_v25 = vmax.f32 %v278_v16, 0.0  ;;  %990 = vmatprep.subr.bf16.mxu1 %v1010_v0  ;;  %v642_v26 = vmax.f32 %v606_v19, %v624_v20  ;;  %v532_v27 = vmax.f32 %v496_v23, %v514_v24  ;;  %v587_v28 = vmax.f32 %v567_v18, %v514_v24  ;;  %v550_v32 = vld [vmem:[#allocation2 + $0x72] sm:$0xff] }
 0x12c   :  { %v282_v30 = vpop.f32.mrb[38].mxu0  ;;  %v681_v31 = vmax.f32 %v661_v21, %v624_v20  ;;  %v699_v37 = vld [vmem:[#allocation2 + $0x6c] sm:$0xff]  ;;  %v497_v42 = vld [vmem:[#allocation2 + $0x78] sm:$0xff] }
 0x12d   :  { %v456_v33 = vmul.f32 %v426_v29, %v309_v25  ;;  %v283_v34 = vadd.f32 %v1260_v53, %v282_v30  ;;  %v965_v35 = vpop.f32.mrb[39].mxu0  ;;  %v568_v38 = vmax.f32 %v532_v27, %v550_v32  ;;  %v607_v39 = vmax.f32 %v587_v28, %v550_v32  ;;  %v625_v44 = vld [vmem:[#allocation2 + $0x73] sm:$0xff] }
 0x12e   :  { %v717_v41 = vmax.f32 %v681_v31, %v699_v37  ;;  %v515_v43 = vld [vmem:[#allocation2 + $0x79] sm:$0xff]  ;;  %v662_v45 = vmax.f32 %v642_v26, %v550_v32 }
 0x12f   :  { %478 = vst.msk [vmem:[#allocation2 + $0x90] sm:$0xff] %vm459_vm4, %v456_v33  ;;  %v310_v46 = vmax.f32 %v283_v34, 0.0  ;;  %v533_v47 = vmax.f32 %v497_v42, %v515_v43  ;;  %v588_v48 = vmax.f32 %v568_v38, %v515_v43  ;;  %v643_v49 = vmax.f32 %v607_v39, %v625_v44  ;;  %v551_v54 = vld [vmem:[#allocation2 + $0x7a] sm:$0xff] }
 0x130   :  { %v287_v51 = vpop.f32.mrb[40].mxu0  ;;  %v991_v52 = vpack.c.bf16 %v717_v41, %v716_v40  ;;  %v626_v60 = vld [vmem:[#allocation2 + $0x7b] sm:$0xff]  ;;  %v682_v62 = vmax.f32 %v662_v45, %v625_v44 }
 0x131   :  { %v457_v55 = vmul.f32 %v431_v50, %v310_v46  ;;  %v288_v56 = vadd.f32 %v1260_v53, %v287_v51  ;;  %v968_v57 = vpop.f32.mrb[41].mxu0  ;;  %v569_v58 = vmax.f32 %v533_v47, %v551_v54  ;;  %v608_v59 = vmax.f32 %v588_v48, %v551_v54  ;;  %v498_v63 = vld [vmem:[#allocation2 + $0x80] sm:$0xff]  ;;  %v436_v53 = vpop.permute.xlu0 %435  ;;  %v700_v12 = vld [vmem:[#allocation2 + $0x74] sm:$0xff] }
 0x132   :  { %992 = vmatpush1.bf16.msra.mxu1 %v991_v52  ;;  %v663_v61 = vmax.f32 %v643_v49, %v551_v54  ;;  %v516_v1 = vld [vmem:[#allocation2 + $0x81] sm:$0xff]  ;;  %v517_v7 = vld [vmem:[#allocation2 + $0x89] sm:$0x3f]  ;;  %v718_v18 = vmax.f32 %v682_v62, %v700_v12  ;;  %v731_v62 = vld [vmem:[%s1355_s4 + $0x38] sm:$0xff] }
 0x133   :  { %479 = vst.msk [vmem:[#allocation2 + $0x98] sm:$0xff] %vm459_vm4, %v457_v55  ;;  %v311_v2 = vmax.f32 %v288_v56, 0.0  ;;  %993 = vmatprep.subr.bf16.mxu1 %v1010_v0  ;;  %v644_v3 = vmax.f32 %v608_v59, %v626_v60  ;;  %v534_v4 = vmax.f32 %v498_v63, %v516_v1  ;;  %v589_v5 = vmax.f32 %v569_v58, %v516_v1  ;;  %v499_v6 = vld [vmem:[#allocation2 + $0x88] sm:$0x3f]  ;;  %v701_v13 = vld [vmem:[#allocation2 + $0x7c] sm:$0xff]  ;;  %v730_v63 = vld [vmem:[%s1355_s4 + $0x30] sm:$0xff] }
 0x134   :  { %v683_v8 = vmax.f32 %v663_v61, %v626_v60  ;;  %v552_v9 = vld [vmem:[#allocation2 + $0x82] sm:$0xff]  ;;  %v535_v10 = vmax.f32 %v499_v6, %v517_v7  ;;  %v553_v17 = vld [vmem:[#allocation2 + $0x8a] sm:$0x3f]  ;;  %v727_v59 = vld [vmem:[%s1355_s4 + $0x18] sm:$0xff] }
 0x135   :  { %v458_v11 = vmul.f32 %v436_v53, %v311_v2  ;;  %v570_v14 = vmax.f32 %v534_v4, %v552_v9  ;;  %v609_v15 = vmax.f32 %v589_v5, %v552_v9  ;;  %v664_v16 = vmax.f32 %v644_v3, %v552_v9  ;;  %v627_v21 = vld [vmem:[#allocation2 + $0x83] sm:$0xff] }
 0x136   :  { %v719_v19 = vmax.f32 %v683_v8, %v701_v13  ;;  %v572_v20 = vld [vmem:[#allocation2 + $0x89] sm:$0xff]  ;;  %v571_v22 = vmax.f32 %v535_v10, %v553_v17  ;;  %v573_v25 = vld [vmem:[#allocation2 + $0x91] sm:$0x3f]  ;;  %v724_v58 = vld [vmem:[%s1355_s4] sm:$0xff] }
 0x137   :  { %481 = vst.msk [vmem:[#allocation2 + $0xa0] sm:$0x3] %vm480_vm5, %v458_v11  ;;  %v590_v23 = vmax.f32 %v570_v14, %v572_v20  ;;  %v645_v24 = vmax.f32 %v609_v15, %v627_v21  ;;  %v592_v27 = vld [vmem:[#allocation2 + $0x8a] sm:$0xff]  ;;  %v684_v31 = vmax.f32 %v664_v16, %v627_v21  ;;  %v593_v32 = vld [vmem:[#allocation2 + $0x92] sm:$0x3f]  ;;  %v728_v61 = vld [vmem:[%s1355_s4 + $0x20] sm:$0xff] }
 0x138   :  { %v994_v26 = vpack.c.bf16 %v719_v19, %v718_v18  ;;  %v591_v28 = vmax.f32 %v571_v22, %v573_v25  ;;  %v628_v33 = vld [vmem:[#allocation2 + $0x8b] sm:$0xff] }
 0x139   :  { %v610_v29 = vmax.f32 %v590_v23, %v592_v27  ;;  %v665_v30 = vmax.f32 %v645_v24, %v592_v27  ;;  %v702_v39 = vld [vmem:[#allocation2 + $0x84] sm:$0xff]  ;;  %v703_v40 = vld [vmem:[#allocation2 + $0x8c] sm:$0xff] }
 0x13a   :  { %995 = vmatpush1.bf16.msra.mxu1 %v994_v26  ;;  %v611_v34 = vmax.f32 %v591_v28, %v593_v32  ;;  %v629_v35 = vld [vmem:[#allocation2 + $0x93] sm:$0x3f]  ;;  %v720_v43 = vmax.f32 %v684_v31, %v702_v39  ;;  %v649_v45 = vld [vmem:[#allocation2 + $0x9a] sm:$0x3f]  ;;  %v729_v60 = vld [vmem:[%s1355_s4 + $0x28] sm:$0xff] }
 0x13b   :  { %996 = vmatprep.subr.bf16.mxu1 %v1010_v0  ;;  %v646_v36 = vmax.f32 %v610_v29, %v628_v33  ;;  %v685_v37 = vmax.f32 %v665_v30, %v628_v33  ;;  %v648_v38 = vld [vmem:[#allocation2 + $0x92] sm:$0xff] }
 0x13c   :  { %v647_v41 = vmax.f32 %v611_v34, %v629_v35  ;;  %v668_v47 = vld [vmem:[#allocation2 + $0x93] sm:$0xff] }
 0x13d   :  { %v666_v42 = vmax.f32 %v646_v36, %v648_v38  ;;  %v721_v44 = vmax.f32 %v685_v37, %v703_v40  ;;  %v704_v52 = vld [vmem:[#allocation2 + $0x94] sm:$0xff] }
 0x13e   :  { %v667_v46 = vmax.f32 %v647_v41, %v649_v45  ;;  %v669_v48 = vld [vmem:[#allocation2 + $0x9b] sm:$0x3f] }
 0x13f   :  { %v997_v49 = vpack.c.bf16 %v721_v44, %v720_v43  ;;  %v686_v50 = vmax.f32 %v666_v42, %v668_v47  ;;  %v705_v54 = vld [vmem:[#allocation2 + $0x9c] sm:$0x3f] }
 0x140   :  { %v687_v51 = vmax.f32 %v667_v46, %v669_v48 }
 0x141   :  { %998 = vmatpush1.bf16.msra.mxu1 %v997_v49  ;;  %v722_v55 = vmax.f32 %v686_v50, %v704_v52 }
 0x142   :  { %999 = vmatprep.subr.bf16.mxu1 %v1010_v0  ;;  %v723_v56 = vmax.f32 %v687_v51, %v705_v54  ;;  %v726_v0 = vld [vmem:[%s1355_s4 + $0x10] sm:$0xff] }
 0x144   :  { %v1000_v57 = vpack.c.bf16 %v723_v56, %v722_v55 }
 0x146   :  { %1002 = vmatpush1.bf16.msk.msra.mxu1 %vm1001_vm8, %v1000_v57 }
 0x149   :  { %814 = vmatmul.mubr.f32.vlgmr.msra.gmra.mrb[0].mxu1 %v724_v58 }
 0x14a   :  { %867 = vmatprep.mubr.msk.f32.mxu1 %vm732_vm3, %v727_v59 }
 0x14d   :  { %819 = vmatmul.mubr.f32.gmra.mrb[2].mxu1 %v726_v0 }
 0x14e   :  { %868 = vmatprep.mubr.msk.f32.mxu1 %vm732_vm3, %v729_v60 }
 0x151   :  { %824 = vmatmul.mubr.f32.gmra.mrb[4].mxu1 %v728_v61 }
 0x152   :  { %869 = vmatprep.mubr.msk.f32.mxu1 %vm732_vm3, %v731_v62 }
 0x155   :  { %829 = vmatmul.mubr.f32.gmra.mrb[6].mxu1 %v730_v63 }
 0x21c   :  { %v815_v1 = vpop.f32.mrb[0].mxu1 }
 0x21d   :  { %834 = vst.msk [vmem:[%s1357_s5] sm:$0xff] %vm459_vm4, %v815_v1  ;;  %v817_v2 = vpop.f32.mrb[1].mxu1 }
 0x220   :  { %v820_v3 = vpop.f32.mrb[2].mxu1 }
 0x221   :  { %835 = vst.msk [vmem:[%s1357_s5 + $0x8] sm:$0xff] %vm459_vm4, %v820_v3  ;;  %v822_v4 = vpop.f32.mrb[3].mxu1 }
 0x224   :  { %v825_v5 = vpop.f32.mrb[4].mxu1 }
 0x225   :  { %836 = vst.msk [vmem:[%s1357_s5 + $0x10] sm:$0xff] %vm459_vm4, %v825_v5  ;;  %v827_v6 = vpop.f32.mrb[5].mxu1 }
 0x228   :  { %v830_v7 = vpop.f32.mrb[6].mxu1 }
 0x229   :  { %837 = vst.msk [vmem:[%s1357_s5 + $0x18] sm:$0xff] %vm459_vm4, %v830_v7  ;;  %v832_v53 = vpop.f32.mrb[7].mxu1 }

</bundles_post_ra>
